<compile_context>
chip_gen: v5e
topology: v5e:2x2
jax: 0.10.0
libtpu: 0.0.40
codegen_flags: <defaults>
</compile_context>

<pallas_src>
import functools
import math

import jax
import jax.numpy as jnp
from jax.experimental import pallas as pl
from jax.experimental.pallas import tpu as pltpu


def _round_up(x, m):
    return ((x + m - 1) // m) * m


def _mlp_fused_kernel(x_ref, w1_ref, b1_ref, w2_ref, b2_ref, o_ref, *,
                      dk, compute_dtype):
    # x_ref: (tm, in)   w1_ref: (in, Hp)  b1_ref: (1, Hp) f32
    # w2_ref: (Hp, Dp)  b2_ref: (1, Dp) f32   o_ref: (tm, dk)
    x = x_ref[...]
    w1 = w1_ref[...]
    w2 = w2_ref[...]
    if compute_dtype is not None:
        x = x.astype(compute_dtype)
        w1 = w1.astype(compute_dtype)
        w2 = w2.astype(compute_dtype)

    # Layer 1 (+bias, ReLU). f32 accumulation on the MXU, biases already f32.
    h = jnp.dot(x, w1, preferred_element_type=jnp.float32) + b1_ref[...]
    h = jnp.maximum(h, 0.0)
    h = h.astype(w2.dtype)

    # Layer 2 (+bias). Intermediate h never leaves VMEM.
    y = jnp.dot(h, w2, preferred_element_type=jnp.float32) + b2_ref[...]
    if dk != y.shape[-1]:
        y = y[:, :dk]                      # drop the zero padding columns
    o_ref[...] = y.astype(o_ref.dtype)


def init_mlp_adv_params(key, in_size, dk=300, dtype=jnp.float32):
    """nn.Linear default init (uniform +/- 1/sqrt(fan_in)), PyTorch (out, in) layout."""
    k1w, k1b, k2w, k2b = jax.random.split(key, 4)
    bound = 1.0 / math.sqrt(in_size)
    w1 = jax.random.uniform(k1w, (in_size, in_size), dtype, -bound, bound)
    b1 = jax.random.uniform(k1b, (in_size,), dtype, -bound, bound)
    w2 = jax.random.uniform(k2w, (dk, in_size), dtype, -bound, bound)
    b2 = jax.random.uniform(k2b, (dk,), dtype, -bound, bound)
    return w1, b1, w2, b2


def prepare_mlp_adv_params(w1, b1, w2, b2, *, param_dtype=None):
    """One-time prep: transpose to (in, out), zero-pad out-dims to 128 multiples.

    Padded hidden columns give relu(0 + 0) = 0 and the matching (zero) rows of
    the padded W2t contribute nothing, so the padding is exact.  Biases are
    pre-cast to f32 so the kernel epilogue has no dtype converts.
    """
    in_size = w1.shape[1]
    dk = w2.shape[0]
    hp = _round_up(in_size, 128)     # padded hidden width (lane-dense)
    dp = _round_up(dk, 128)          # padded output width

    wdt = param_dtype if param_dtype is not None else w1.dtype
    w1t = jnp.zeros((in_size, hp), wdt).at[:, :in_size].set(w1.T.astype(wdt))
    b1p = jnp.zeros((1, hp), jnp.float32).at[0, :in_size].set(b1.astype(jnp.float32))
    w2t = jnp.zeros((hp, dp), wdt).at[:in_size, :dk].set(w2.T.astype(wdt))
    b2p = jnp.zeros((1, dp), jnp.float32).at[0, :dk].set(b2.astype(jnp.float32))
    return {"w1t": w1t, "b1": b1p, "w2t": w2t, "b2": b2p, "dk": dk}


def mlp_adv_forward(x, params, *, compute_dtype=None, max_tm=256):
    """Pallas equivalent of MLP_adv.forward: linear2(relu(linear1(x)))."""
    orig_shape = x.shape
    in_size = orig_shape[-1]
    w1t, b1 = params["w1t"], params["b1"]
    w2t, b2 = params["w2t"], params["b2"]
    dk = params["dk"]
    hp = w1t.shape[1]
    dp = w2t.shape[1]

    xm = x.reshape(-1, in_size)                    # x is never padded / copied
    M = xm.shape[0]

    # M-tile: >=8 rows (f32 sublane), capped so large M exposes >=2 blocks
    # (v7x megacore); small M uses a single full block.
    tm = min(max_tm, _round_up(M, 8))
    grid = (pl.cdiv(M, tm),)

    x_item = xm.dtype.itemsize
    w_item = w1t.dtype.itemsize

    # VMEM budget computed from the actual footprint (resident weights may be
    # double-buffered by Pallas; 4x headroom for compiler scratch).
    resident = (in_size * hp + hp * dp) * w_item + (hp + dp) * 4
    per_step = 2 * tm * (in_size + dk) * x_item            # double-buffered x / out
    live = tm * (hp + dp) * 4 * 2                          # h / y intermediates
    vmem_limit = int(min(max(4 * (resident + per_step + live), 8 << 20), 64 << 20))
    # TODO(synk): stream weights with an N/K grid if in_size grows so large
    # that the resident weights no longer fit comfortably in VMEM.
    assert 2 * resident + per_step + live < 48 * 1024 * 1024, (
        "weights too large for the VMEM-resident fused path")

    cost = pl.CostEstimate(
        flops=2 * M * in_size * hp + 2 * M * hp * dp,
        transcendentals=0,
        bytes_accessed=(M * in_size * x_item + resident + M * dk * x_item),
    )

    kernel = functools.partial(_mlp_fused_kernel, dk=dk, compute_dtype=compute_dtype)

    out = pl.pallas_call(
        kernel,
        out_shape=jax.ShapeDtypeStruct((M, dk), x.dtype),
        grid=grid,
        in_specs=[
            pl.BlockSpec((tm, in_size), lambda i: (i, 0)),   # x tile (streams over M)
            pl.BlockSpec((in_size, hp), lambda i: (0, 0)),   # W1t, VMEM-resident
            pl.BlockSpec((1, hp), lambda i: (0, 0)),         # b1 (f32)
            pl.BlockSpec((hp, dp), lambda i: (0, 0)),         # W2t, VMEM-resident
            pl.BlockSpec((1, dp), lambda i: (0, 0)),          # b2 (f32)
        ],
        out_specs=pl.BlockSpec((tm, dk), lambda i: (i, 0)),
        compiler_params=pltpu.CompilerParams(
            dimension_semantics=("parallel",),
            vmem_limit_bytes=vmem_limit,
        ),
        cost_estimate=cost,
    )(xm, w1t, b1, w2t, b2)

    return out.reshape(*orig_shape[:-1], dk)


if __name__ == "__main__":
    in_size, dk = 32, 300
    batch, seq = 2, 8

    key = jax.random.PRNGKey(0)
    kx, kp = jax.random.split(key)
    x = jax.random.normal(kx, (batch, seq, in_size), jnp.float32)
    w1, b1, w2, b2 = init_mlp_adv_params(kp, in_size, dk=dk)
    params = prepare_mlp_adv_params(w1, b1, w2, b2)   # f32 weights -> exact check
    # (bf16 fast path: prepare_mlp_adv_params(..., param_dtype=jnp.bfloat16) and
    #  mlp_adv_forward(..., compute_dtype=jnp.bfloat16); needs looser tolerances.)

    y = mlp_adv_forward(x, params)
    y = jax.block_until_ready(y)

    # Reference (plain JAX, PyTorch weight convention).
    h_ref = jnp.maximum(x @ w1.T + b1, 0.0)
    y_ref = h_ref @ w2.T + b2

    assert y.shape == (batch, seq, dk), y.shape
    assert jnp.allclose(y, y_ref, atol=1e-4, rtol=1e-4), float(
        jnp.max(jnp.abs(y - y_ref))
    )

    print("KERNEL_OK")
</pallas_src>

<mosaic_0001>
module attributes {stable_mosaic.version = 11 : i64} {
  func.func @_mlp_fused_kernel(%arg0: i32, %arg1: memref<16x32xf32, #tpu.memory_space<vmem>>, %arg2: memref<32x128xf32, #tpu.memory_space<vmem>>, %arg3: memref<1x128xf32, #tpu.memory_space<vmem>>, %arg4: memref<128x384xf32, #tpu.memory_space<vmem>>, %arg5: memref<1x384xf32, #tpu.memory_space<vmem>>, %arg6: memref<16x300xf32, #tpu.memory_space<vmem>>) attributes {dimension_semantics = [#tpu.dimension_semantics<parallel>], iteration_bounds = array<i64: 1>, scalar_prefetch = 0 : i64, scratch_operands = 0 : i64, tpu.core_type = #tpu.core_type<tc>, window_params = [{transform_indices = @transform_0, window_bounds = array<i64: 16, 32>}, {pipeline_mode = #tpu.pipeline_mode<synchronous>, transform_indices = @transform_1, window_bounds = array<i64: 32, 128>}, {pipeline_mode = #tpu.pipeline_mode<synchronous>, transform_indices = @transform_2, window_bounds = array<i64: 1, 128>}, {pipeline_mode = #tpu.pipeline_mode<synchronous>, transform_indices = @transform_3, window_bounds = array<i64: 128, 384>}, {pipeline_mode = #tpu.pipeline_mode<synchronous>, transform_indices = @transform_4, window_bounds = array<i64: 1, 384>}, {transform_indices = @transform_5, window_bounds = array<i64: 16, 300>}]} {
    %c0 = arith.constant 0 : index
    %c0_0 = arith.constant 0 : index
    %0 = vector.load %arg1[%c0, %c0_0] : memref<16x32xf32, #tpu.memory_space<vmem>>, vector<16x32xf32>
    %c0_1 = arith.constant 0 : index
    %c0_2 = arith.constant 0 : index
    %1 = vector.load %arg2[%c0_1, %c0_2] : memref<32x128xf32, #tpu.memory_space<vmem>>, vector<32x128xf32>
    %c0_3 = arith.constant 0 : index
    %c0_4 = arith.constant 0 : index
    %2 = vector.load %arg4[%c0_3, %c0_4] : memref<128x384xf32, #tpu.memory_space<vmem>>, vector<128x384xf32>
    %cst = arith.constant dense<0.000000e+00> : vector<16x128xf32>
    %3 = tpu.matmul %0, %1, %cst {dimension_numbers = #tpu.dot_dimension_numbers<[1], [0], [0], [1], [0, 0, 1, 1], [], []>} : vector<16x32xf32>, vector<32x128xf32>, vector<16x128xf32> -> vector<16x128xf32>
    %c0_5 = arith.constant 0 : index
    %c0_6 = arith.constant 0 : index
    %4 = vector.load %arg3[%c0_5, %c0_6] : memref<1x128xf32, #tpu.memory_space<vmem>>, vector<1x128xf32>
    %5 = vector.broadcast %4 : vector<1x128xf32> to vector<16x128xf32>
    %6 = arith.addf %3, %5 : vector<16x128xf32>
    %cst_7 = arith.constant 0.000000e+00 : f32
    %7 = vector.broadcast %cst_7 : f32 to vector<16x128xf32>
    %8 = arith.maximumf %6, %7 : vector<16x128xf32>
    %cst_8 = arith.constant dense<0.000000e+00> : vector<16x384xf32>
    %9 = tpu.matmul %8, %2, %cst_8 {dimension_numbers = #tpu.dot_dimension_numbers<[1], [0], [0], [1], [0, 0, 1, 1], [], []>} : vector<16x128xf32>, vector<128x384xf32>, vector<16x384xf32> -> vector<16x384xf32>
    %c0_9 = arith.constant 0 : index
    %c0_10 = arith.constant 0 : index
    %10 = vector.load %arg5[%c0_9, %c0_10] : memref<1x384xf32, #tpu.memory_space<vmem>>, vector<1x384xf32>
    %11 = vector.broadcast %10 : vector<1x384xf32> to vector<16x384xf32>
    %12 = arith.addf %9, %11 : vector<16x384xf32>
    %13 = vector.extract_strided_slice %12 {offsets = [0, 0], sizes = [16, 300], strides = [1, 1]} : vector<16x384xf32> to vector<16x300xf32>
    %c0_11 = arith.constant 0 : index
    %c0_12 = arith.constant 0 : index
    %14 = vector.load %arg6[%c0_11, %c0_12] : memref<16x300xf32, #tpu.memory_space<vmem>>, vector<16x300xf32>
    tpu.vector_store %arg6[%c0_11, %c0_12], %13 {strides = array<i32>} : memref<16x300xf32, #tpu.memory_space<vmem>>, vector<16x300xf32>,
    return
  }
  func.func @transform_0(%arg0: i32) -> (i32, i32) {
    %c0_i32 = arith.constant 0 : i32
    %c0_i32_0 = arith.constant 0 : i32
    return %arg0, %c0_i32 : i32, i32
  }
  func.func @transform_1(%arg0: i32) -> (i32, i32) {
    %c0_i32 = arith.constant 0 : i32
    %c0_i32_0 = arith.constant 0 : i32
    %c0_i32_1 = arith.constant 0 : i32
    return %c0_i32, %c0_i32_0 : i32, i32
  }
  func.func @transform_2(%arg0: i32) -> (i32, i32) {
    %c0_i32 = arith.constant 0 : i32
    %c0_i32_0 = arith.constant 0 : i32
    %c0_i32_1 = arith.constant 0 : i32
    return %c0_i32, %c0_i32_0 : i32, i32
  }
  func.func @transform_3(%arg0: i32) -> (i32, i32) {
    %c0_i32 = arith.constant 0 : i32
    %c0_i32_0 = arith.constant 0 : i32
    %c0_i32_1 = arith.constant 0 : i32
    return %c0_i32, %c0_i32_0 : i32, i32
  }
  func.func @transform_4(%arg0: i32) -> (i32, i32) {
    %c0_i32 = arith.constant 0 : i32
    %c0_i32_0 = arith.constant 0 : i32
    %c0_i32_1 = arith.constant 0 : i32
    return %c0_i32, %c0_i32_0 : i32, i32
  }
  func.func @transform_5(%arg0: i32) -> (i32, i32) {
    %c0_i32 = arith.constant 0 : i32
    %c0_i32_0 = arith.constant 0 : i32
    return %arg0, %c0_i32 : i32, i32
  }
}

</mosaic_0001>

<bundles_post_ra>
// kernel: tpu_custom_call.1
= control target key start
LH: loop header
LB: loop body
LE: loop exit
PB: predicated region body
PF: predicated region fallthrough
CT: control target
= control target key end

     0   :  { %10 = vsyncpa [#allocation3], 0  ;;  %s484_s0 = inlined_call_operand.hbm [shape: f32[16,32], index: 0, kind: input, shape index: {}]   ;;  %s485_s1 = inlined_call_operand.hbm [shape: f32[32,128], index: 1, kind: input, shape index: {}]   ;;  %s486_s2 = inlined_call_operand.hbm [shape: f32[1,128], index: 2, kind: input, shape index: {}]   ;;  %s487_s3 = inlined_call_operand.hbm [shape: f32[128,384], index: 3, kind: input, shape index: {}]   ;;  %s488_s4 = inlined_call_operand.vmem [shape: f32[1,384], index: 4, kind: input, shape index: {}]   ;;  %s489_s5 = inlined_call_operand.hbm [shape: f32[16,300], index: 5, kind: output, shape index: {}]  }
   0x1   :  { %11 = vsyncpa [#allocation6], 0 }
   0x2   :  { %12 = vsyncpa [#allocation9], 0 }
   0x3   :  { %13 = vsyncpa [#allocation4], 0  ;;  %s31_s20 = sshll.u32 %s485_s1, 4  ;;  %s417_s21 = smov [#allocation5]   ;;  %s32_s20 = int_to_ptr.hbm [resolvable:$true] %s31_s20 }
   0x4   :  { %s33_s22 = sshll.u32 %s417_s21, 4  ;;  %s18_s25 = sshll.u32 %s484_s0, 4  ;;  %s34_s22 = int_to_ptr.vmem [resolvable:$true] %s33_s22  ;;  %s19_s25 = int_to_ptr.hbm [resolvable:$true] %s18_s25 }
   0x5   :  { %s418_s26 = smov 128   ;;  %s419_s27 = smov 8  }
   0x6   :  { %39 = dma.hbm_to_vmem [thread:$0]  %s32_s20, 512, %s34_s22, [#allocation6], %s418_s26, %s418_s26, %s419_s27  }
   0x7   :  { %s420_s28 = smov [#allocation2]   ;;  %s45_s7 = sshll.u32 %s486_s2, 4  ;;  %s46_s7 = int_to_ptr.hbm [resolvable:$true] %s45_s7 }
   0x8   :  { %s20_s29 = sshll.u32 %s420_s28, 4  ;;  %s55_s9 = sshll.u32 %s487_s3, 4  ;;  %s21_s29 = int_to_ptr.vmem [resolvable:$true] %s20_s29  ;;  %s56_s9 = int_to_ptr.hbm [resolvable:$true] %s55_s9 }
   0x9   :  { %26 = dma.hbm_to_vmem [thread:$0]  %s19_s25, 256, %s21_s29, [#allocation3], %s418_s26, %s418_s26, %s419_s27  }
   0xa   :  { %s421_s10 = smov [#allocation7]   ;;  %s422_s0 = smov [#allocation8]  }
   0xb   :  { %s47_s11 = sshll.u32 %s421_s10, 4  ;;  %s57_s12 = sshll.u32 %s422_s0, 4  ;;  %s48_s11 = int_to_ptr.vmem [resolvable:$true] %s47_s11  ;;  %s58_s12 = int_to_ptr.vmem [resolvable:$true] %s57_s12 }
   0xc   :  { %50 = dma.hbm_to_vmem [thread:$0]  %s46_s7, 16, %s48_s11, [#allocation6]  }
   0xd   :  { %s423_s13 = smov 384   ;;  %s424_s14 = smov 24  }
   0xe   :  { %63 = dma.hbm_to_vmem [thread:$0]  %s56_s9, 6144, %s58_s12, [#allocation9], %s423_s13, %s423_s13, %s424_s14  }
   0xf   :  { %409 = dma.done.wait [#allocation3], 256  }
  0x10   :  { %410 = vsyncadd [#allocation3], 4294967040 }
  0x11   :  { %411 = dma.done.wait [#allocation6], 528  }
  0x12   :  { %412 = vsyncadd [#allocation6], 4294966768 }
  0x13   :  { %413 = dma.done.wait [#allocation9], 6144  }
  0x14   :  { %414 = vsyncadd [#allocation9], 4294961152  ;;  %v87_v0 = vld [vmem:[#allocation5 + $0x18] sm:$0xff]  ;;  %v86_v1 = vld [vmem:[#allocation5 + $0x10] sm:$0xff]  ;;  %vm140_vm0 = vcmask 261120   ;;  %vm251_vm1 = vcmask 359424  }
  0x15   :  { %159 = vmatpush.msra.mxu0 %v87_v0  ;;  %v85_v2 = vld [vmem:[#allocation5 + $0x8] sm:$0xff]  ;;  %v134_v4 = vld [vmem:[#allocation8 + $0x170] sm:$0xff]  ;;  %v135_v5 = vld [vmem:[#allocation8 + $0x178] sm:$0xff]  ;;  %s425_s15 = smov [#allocation10]   ;;  %s262_s18 = sshll.u32 %s489_s5, 4  ;;  %s263_s18 = int_to_ptr.hbm [resolvable:$true] %s262_s18 }
  0x16   :  { %v133_v3 = vld [vmem:[#allocation8 + $0x168] sm:$0xff]  ;;  %v130_v6 = vld [vmem:[#allocation8 + $0x150] sm:$0xff]  ;;  %v131_v7 = vld [vmem:[#allocation8 + $0x158] sm:$0xff]  ;;  %203 = vmatpush.msra.mxu2 %v134_v4  ;;  %226 = vmatpush.msra.mxu3 %v135_v5  ;;  %s260_s16 = sshll.u32 %s425_s15, 4  ;;  %s261_s16 = int_to_ptr.vmem [resolvable:$true] %s260_s16 }
  0x17   :  { %160 = vmatpush.msra.mxu0 %v86_v1  ;;  %180 = vmatpush.msra.mxu1 %v133_v3  ;;  %v132_v8 = vld [vmem:[#allocation8 + $0x160] sm:$0xff]  ;;  %v127_v10 = vld [vmem:[#allocation8 + $0x138] sm:$0xff]  ;;  %v82_v11 = vld [vmem:[#allocation2] sm:$0xff] }
  0x18   :  { %v84_v9 = vld [vmem:[#allocation5] sm:$0xff]  ;;  %204 = vmatpush.msra.mxu2 %v131_v7  ;;  %227 = vmatpush.msra.mxu3 %v132_v8  ;;  %v129_v13 = vld [vmem:[#allocation8 + $0x148] sm:$0xff]  ;;  %v126_v16 = vld [vmem:[#allocation8 + $0x130] sm:$0xff] }
  0x19   :  { %161 = vmatpush.msra.mxu0 %v85_v2  ;;  %181 = vmatpush.msra.mxu1 %v130_v6  ;;  %v128_v12 = vld [vmem:[#allocation8 + $0x140] sm:$0xff]  ;;  %v125_v15 = vld [vmem:[#allocation8 + $0x128] sm:$0xff]  ;;  %v122_v18 = vld [vmem:[#allocation8 + $0x110] sm:$0xff] }
  0x1a   :  { %v124_v14 = vld [vmem:[#allocation8 + $0x120] sm:$0xff]  ;;  %205 = vmatpush.msra.mxu2 %v128_v12  ;;  %v121_v17 = vld [vmem:[#allocation8 + $0x108] sm:$0xff]  ;;  %228 = vmatpush.msra.mxu3 %v129_v13  ;;  %v123_v19 = vld [vmem:[#allocation8 + $0x118] sm:$0xff] }
  0x1b   :  { %162 = vmatpush.msra.mxu0 %v84_v9  ;;  %182 = vmatpush.msra.mxu1 %v127_v10  ;;  %v118_v20 = vld [vmem:[#allocation8 + $0xf0] sm:$0xff]  ;;  %v119_v21 = vld [vmem:[#allocation8 + $0xf8] sm:$0xff]  ;;  %v120_v22 = vld [vmem:[#allocation8 + $0x100] sm:$0xff] }
  0x1c   :  { %277 = vmatmul.msk.f32.vlgmr.msra.gmra.mxu0 %vm140_vm0, %v82_v11  ;;  %206 = vmatpush.msra.mxu2 %v125_v15  ;;  %v115_v23 = vld [vmem:[#allocation8 + $0xd8] sm:$0xff]  ;;  %v116_v25 = vld [vmem:[#allocation8 + $0xe0] sm:$0xff]  ;;  %v117_v26 = vld [vmem:[#allocation8 + $0xe8] sm:$0xff] }
  0x1d   :  { %183 = vmatpush.msra.mxu1 %v124_v14  ;;  %229 = vmatpush.msra.mxu3 %v126_v16  ;;  %v83_v24 = vld [vmem:[#allocation2 + $0x8] sm:$0xff]  ;;  %v112_v27 = vld [vmem:[#allocation8 + $0xc0] sm:$0xff]  ;;  %v113_v28 = vld [vmem:[#allocation8 + $0xc8] sm:$0xff] }
  0x1e   :  { %207 = vmatpush.msra.mxu2 %v122_v18  ;;  %v114_v29 = vld [vmem:[#allocation8 + $0xd0] sm:$0xff]  ;;  %v109_v30 = vld [vmem:[#allocation8 + $0xa8] sm:$0xff]  ;;  %v111_v32 = vld [vmem:[#allocation8 + $0xb8] sm:$0xff] }
  0x1f   :  { %184 = vmatpush.msra.mxu1 %v121_v17  ;;  %230 = vmatpush.msra.mxu3 %v123_v19  ;;  %v110_v31 = vld [vmem:[#allocation8 + $0xb0] sm:$0xff]  ;;  %v107_v34 = vld [vmem:[#allocation8 + $0x98] sm:$0xff]  ;;  %v108_v35 = vld [vmem:[#allocation8 + $0xa0] sm:$0xff] }
  0x20   :  { %208 = vmatpush.msra.mxu2 %v119_v21  ;;  %v106_v33 = vld [vmem:[#allocation8 + $0x90] sm:$0xff]  ;;  %v103_v36 = vld [vmem:[#allocation8 + $0x78] sm:$0xff]  ;;  %v104_v37 = vld [vmem:[#allocation8 + $0x80] sm:$0xff] }
  0x21   :  { %185 = vmatpush.msra.mxu1 %v118_v20  ;;  %231 = vmatpush.msra.mxu3 %v120_v22  ;;  %v105_v38 = vld [vmem:[#allocation8 + $0x88] sm:$0xff]  ;;  %v100_v39 = vld [vmem:[#allocation8 + $0x60] sm:$0xff]  ;;  %v102_v41 = vld [vmem:[#allocation8 + $0x70] sm:$0xff] }
  0x22   :  { %209 = vmatpush.msra.mxu2 %v116_v25  ;;  %v101_v40 = vld [vmem:[#allocation8 + $0x68] sm:$0xff]  ;;  %v98_v43 = vld [vmem:[#allocation8 + $0x50] sm:$0xff]  ;;  %v99_v44 = vld [vmem:[#allocation8 + $0x58] sm:$0xff] }
  0x23   :  { %186 = vmatpush.msra.mxu1 %v115_v23  ;;  %232 = vmatpush.msra.mxu3 %v117_v26  ;;  %v97_v42 = vld [vmem:[#allocation8 + $0x48] sm:$0xff]  ;;  %v94_v45 = vld [vmem:[#allocation8 + $0x30] sm:$0xff]  ;;  %v95_v46 = vld [vmem:[#allocation8 + $0x38] sm:$0xff] }
  0x24   :  { %278 = vmatmul.msk.f32.gmra.mxu0 %vm140_vm0, %v83_v24  ;;  %210 = vmatpush.msra.mxu2 %v113_v28  ;;  %v96_v47 = vld [vmem:[#allocation8 + $0x40] sm:$0xff]  ;;  %v91_v48 = vld [vmem:[#allocation8 + $0x18] sm:$0xff]  ;;  %v93_v50 = vld [vmem:[#allocation8 + $0x28] sm:$0xff] }
  0x25   :  { %187 = vmatpush.msra.mxu1 %v112_v27  ;;  %233 = vmatpush.msra.mxu3 %v114_v29  ;;  %v92_v49 = vld [vmem:[#allocation8 + $0x20] sm:$0xff]  ;;  %v89_v52 = vld [vmem:[#allocation8 + $0x8] sm:$0xff]  ;;  %v90_v53 = vld [vmem:[#allocation8 + $0x10] sm:$0xff] }
  0x26   :  { %211 = vmatpush.msra.mxu2 %v110_v31  ;;  %v88_v51 = vld [vmem:[#allocation8] sm:$0xff]  ;;  %v288_v54 = vld [vmem:[#allocation7] ss:$0 sm:$0xff]  ;;  %v172_v61 = vld [vmem:[%s488_s4] sm:$0x7] }
  0x27   :  { %188 = vmatpush.msra.mxu1 %v109_v30  ;;  %234 = vmatpush.msra.mxu3 %v111_v32  ;;  %v174_v62 = vperm.slane %v172_v61, 0  ;;  %v175_v1 = vperm.slane %v172_v61, 1  ;;  %v176_v2 = vperm.slane %v172_v61, 2 }
  0x28   :  { %212 = vmatpush.msra.mxu2 %v107_v34 }
  0x29   :  { %189 = vmatpush.msra.mxu1 %v106_v33  ;;  %235 = vmatpush.msra.mxu3 %v108_v35 }
  0x2a   :  { %213 = vmatpush.msra.mxu2 %v104_v37 }
  0x2b   :  { %190 = vmatpush.msra.mxu1 %v103_v36  ;;  %236 = vmatpush.msra.mxu3 %v105_v38 }
  0x2c   :  { %214 = vmatpush.msra.mxu2 %v101_v40 }
  0x2d   :  { %191 = vmatpush.msra.mxu1 %v100_v39  ;;  %237 = vmatpush.msra.mxu3 %v102_v41 }
  0x2e   :  { %215 = vmatpush.msra.mxu2 %v98_v43 }
  0x2f   :  { %192 = vmatpush.msra.mxu1 %v97_v42  ;;  %238 = vmatpush.msra.mxu3 %v99_v44 }
  0x30   :  { %216 = vmatpush.msra.mxu2 %v95_v46 }
  0x31   :  { %193 = vmatpush.msra.mxu1 %v94_v45  ;;  %239 = vmatpush.msra.mxu3 %v96_v47 }
  0x32   :  { %217 = vmatpush.msra.mxu2 %v92_v49 }
  0x33   :  { %194 = vmatpush.msra.mxu1 %v91_v48  ;;  %240 = vmatpush.msra.mxu3 %v93_v50 }
  0x34   :  { %218 = vmatpush.msra.mxu2 %v89_v52 }
  0x35   :  { %195 = vmatpush.msra.mxu1 %v88_v51  ;;  %241 = vmatpush.msra.mxu3 %v90_v53 }
  0x99   :  { %v164_v55 = vpop.f32.mrf.mxu0 }
  0x9a   :  { %v165_v56 = vadd.f32 %v288_v54, %v164_v55 }
  0x9c   :  { %v170_v57 = vmax.f32 %v165_v56, 0.0 }
  0x9e   :  { %196 = vmatmul.f32.vlgmr.msra.gmra.mxu1 %v170_v57  ;;  %219 = vmatmul.f32.vlgmr.msra.gmra.mxu2 %v170_v57 }
  0x9f   :  { %242 = vmatmul.f32.vlgmr.msra.gmra.mxu3 %v170_v57 }
  0xa1   :  { %v167_v58 = vpop.f32.mrf.mxu0 }
  0xa2   :  { %v168_v59 = vadd.f32 %v288_v54, %v167_v58 }
  0xa4   :  { %v171_v60 = vmax.f32 %v168_v59, 0.0 }
  0xa6   :  { %199 = vmatmul.f32.gmra.mxu1 %v171_v60  ;;  %222 = vmatmul.f32.gmra.mxu2 %v171_v60 }
  0xa7   :  { %245 = vmatmul.f32.gmra.mxu3 %v171_v60 }
 0x11b   :  { %v197_v63 = vpop.f32.mrf.mxu1 }
 0x11c   :  { %v198_v0 = vadd.f32 %v197_v63, %v174_v62 }
 0x11e   :  { %249 = vst [vmem:[#allocation10] sm:$0xff] %v198_v0 }
 0x121   :  { %v220_v3 = vpop.f32.mrf.mxu2 }
 0x122   :  { %v221_v4 = vadd.f32 %v220_v3, %v175_v1  ;;  %v243_v5 = vpop.f32.mrf.mxu3 }
 0x123   :  { %v244_v6 = vadd.f32 %v243_v5, %v176_v2  ;;  %v200_v7 = vpop.f32.mrf.mxu1 }
 0x124   :  { %250 = vst [vmem:[#allocation10 + $0x8] sm:$0xff] %v221_v4  ;;  %v201_v8 = vadd.f32 %v200_v7, %v174_v62 }
 0x125   :  { %252 = vst.msk [vmem:[#allocation10 + $0x10] sm:$0xff] %vm251_vm1, %v244_v6 }
 0x126   :  { %253 = vst [vmem:[#allocation10 + $0x18] sm:$0xff] %v201_v8 }
 0x129   :  { %v223_v9 = vpop.f32.mrf.mxu2 }
 0x12a   :  { %v224_v10 = vadd.f32 %v223_v9, %v175_v1  ;;  %v246_v11 = vpop.f32.mrf.mxu3 }
 0x12b   :  { %v247_v12 = vadd.f32 %v246_v11, %v176_v2 }
 0x12c   :  { %254 = vst [vmem:[#allocation10 + $0x20] sm:$0xff] %v224_v10 }
 0x12d   :  { %255 = vst.msk [vmem:[#allocation10 + $0x28] sm:$0xff] %vm251_vm1, %v247_v12 }
 0x12e   :  { %268 = dma.vmem_to_hbm [thread:$0]  %s261_s16, 768, %s263_s18, [#allocation4], %s423_s13, %s423_s13, %s424_s14  }
 0x12f   :  { %415 = dma.done.wait [#allocation4], 768  }
 0x130   :  { %416 = vsyncadd [#allocation4], 4294966528 }
 0x131   :  { %273 = vsyncpa [#allocation3], 1 }
 0x132   :  { %274 = vsyncpa [#allocation6], 1 }
 0x133   :  { %275 = vsyncpa [#allocation9], 1 }
 0x134   :  { %276 = vsyncpa [#allocation4], 1 }

</bundles_post_ra>
